<compile_context>
chip_gen: v5e
topology: v5e:2x2
jax: 0.10.0
libtpu: 0.0.40
codegen_flags: <defaults>
</compile_context>

<pallas_src>
import math

import numpy as np

import jax
import jax.numpy as jnp
from jax.experimental import pallas as pl
from jax.experimental.pallas import tpu as pltpu


_MAX_RES = 15.0
_MIN_RES = 15.0 / 2000.0
_DIV_FACTOR = 4


def _make_frequencies(max_res=_MAX_RES, min_res=_MIN_RES, div_factor=_DIV_FACTOR):
    n_frequencies = int(math.log(max_res / min_res, div_factor)) + 1
    freqs = (
        2.0 * math.pi * (float(div_factor) ** np.arange(n_frequencies, dtype=np.float64)) / max_res
    ).astype(np.float32)
    return freqs  # (n_frequencies,) float32 numpy array


def _round_up(x, m):
    return ((x + m - 1) // m) * m


def sinusoids_embedding(x, *, max_res=_MAX_RES, min_res=_MIN_RES,
                        div_factor=_DIV_FACTOR, tile_n=2048):
    """x: (N, 1) or (N,) float32 -> (N, 2 * n_freq) float32 (EquiDock SinusoidsEmbedding)."""
    assert tile_n % 128 == 0, "lane tile must be a multiple of 128"

    freqs_np = _make_frequencies(max_res, min_res, div_factor)
    n_freq = int(freqs_np.shape[0])
    # Bake the (static) frequencies into the kernel as exact f32 scalar constants.
    freq_vals = tuple(float(f) for f in freqs_np)

    N = int(x.shape[0])
    x_flat = jnp.reshape(x, (N,)).astype(jnp.float32)

    # Lane-dense layout: N on the lane axis, padded to a multiple of the tile.
    # NOTE (v7x): for very large N the grid has many steps, so the "parallel"
    # axis shards across both TensorCores automatically.
    tile = min(tile_n, _round_up(N, 128))
    n_pad = _round_up(N, tile)
    if n_pad != N:
        x_flat = jnp.pad(x_flat, (0, n_pad - N))
    x2d = x_flat.reshape(1, n_pad)

    def kernel(x_ref, out_ref):
        # x_ref:   (1, tile)            VMEM
        # out_ref: (2, n_freq, tile)    VMEM   (row 0 = sin block, row 1 = cos block)
        sqrtx = jnp.sqrt(x_ref[...] + 1e-8)                                   # (1, tile)
        emb = jnp.concatenate([f * sqrtx for f in freq_vals], axis=0)         # (n_freq, tile)
        out_ref[0, :, :] = jnp.sin(emb)
        out_ref[1, :, :] = jnp.cos(emb)

    out = pl.pallas_call(
        kernel,
        out_shape=jax.ShapeDtypeStruct((2, n_freq, n_pad), jnp.float32),
        grid_spec=pltpu.PrefetchScalarGridSpec(
            num_scalar_prefetch=0,
            grid=(n_pad // tile,),
            in_specs=[pl.BlockSpec((1, tile), lambda i: (0, i))],
            out_specs=pl.BlockSpec((2, n_freq, tile), lambda i: (0, 0, i)),
        ),
        compiler_params=pltpu.CompilerParams(
            dimension_semantics=("parallel",),
        ),
    )(x2d)

    # (2, n_freq, N_pad) -> (N, 2*n_freq): columns [0:n_freq] = sin, [n_freq:] = cos,
    # matching torch.cat((sin, cos), dim=-1).
    out = jnp.transpose(out, (2, 0, 1)).reshape(n_pad, 2 * n_freq)[:N]
    return out


def _reference(x, frequencies):
    xs = jnp.sqrt(x + 1e-8)
    emb = xs * frequencies[None, :]
    return jnp.concatenate((jnp.sin(emb), jnp.cos(emb)), axis=-1)


if __name__ == "__main__":
    key = jax.random.PRNGKey(0)
    N = 300  # arbitrary (non-multiple-of-128) number of "edges" to exercise padding
    # squared-distance-like positive inputs
    x = jax.random.uniform(key, (N, 1), dtype=jnp.float32, minval=0.0, maxval=10.0)

    freqs = jnp.asarray(_make_frequencies())  # same exact f32 values the kernel bakes in

    out = sinusoids_embedding(x)
    out = jax.block_until_ready(out)

    ref = _reference(x, freqs)
    assert out.shape == (N, 2 * freqs.shape[0])
    assert jnp.allclose(out, ref, atol=1e-5, rtol=1e-5), "mismatch vs reference"

    print("KERNEL_OK")
</pallas_src>

<mosaic_0001>
module attributes {stable_mosaic.version = 11 : i64} {
  func.func @kernel(%arg0: i32, %arg1: memref<1x384xf32, #tpu.memory_space<vmem>>, %arg2: memref<2x6x384xf32, #tpu.memory_space<vmem>>) attributes {dimension_semantics = [#tpu.dimension_semantics<parallel>], iteration_bounds = array<i64: 1>, scalar_prefetch = 0 : i64, scratch_operands = 0 : i64, tpu.core_type = #tpu.core_type<tc>, window_params = [{transform_indices = @transform_0, window_bounds = array<i64: 1, 384>}, {transform_indices = @transform_1, window_bounds = array<i64: 2, 6, 384>}]} {
    %c0 = arith.constant 0 : index
    %c0_0 = arith.constant 0 : index
    %0 = vector.load %arg1[%c0, %c0_0] : memref<1x384xf32, #tpu.memory_space<vmem>>, vector<1x384xf32>
    %cst = arith.constant 9.99999993E-9 : f32
    %1 = vector.broadcast %cst : f32 to vector<1x384xf32>
    %2 = arith.addf %0, %1 : vector<1x384xf32>
    %3 = math.sqrt %2 : vector<1x384xf32>
    %cst_1 = arith.constant 0.418879032 : f32
    %4 = vector.broadcast %cst_1 : f32 to vector<1x384xf32>
    %5 = arith.mulf %4, %3 : vector<1x384xf32>
    %cst_2 = arith.constant 1.67551613 : f32
    %6 = vector.broadcast %cst_2 : f32 to vector<1x384xf32>
    %7 = arith.mulf %6, %3 : vector<1x384xf32>
    %cst_3 = arith.constant 6.70206451 : f32
    %8 = vector.broadcast %cst_3 : f32 to vector<1x384xf32>
    %9 = arith.mulf %8, %3 : vector<1x384xf32>
    %cst_4 = arith.constant 26.8082581 : f32
    %10 = vector.broadcast %cst_4 : f32 to vector<1x384xf32>
    %11 = arith.mulf %10, %3 : vector<1x384xf32>
    %cst_5 = arith.constant 107.233032 : f32
    %12 = vector.broadcast %cst_5 : f32 to vector<1x384xf32>
    %13 = arith.mulf %12, %3 : vector<1x384xf32>
    %cst_6 = arith.constant 428.932129 : f32
    %14 = vector.broadcast %cst_6 : f32 to vector<1x384xf32>
    %15 = arith.mulf %14, %3 : vector<1x384xf32>
    %16 = tpu.concatenate %5, %7, %9, %11, %13, %15 in 0 : vector<1x384xf32>, vector<1x384xf32>, vector<1x384xf32>, vector<1x384xf32>, vector<1x384xf32>, vector<1x384xf32> -> vector<6x384xf32>
    %17 = math.sin %16 : vector<6x384xf32>
    %c0_7 = arith.constant 0 : index
    %c0_8 = arith.constant 0 : index
    %c0_9 = arith.constant 0 : index
    %18 = vector.load %arg2[%c0_7, %c0_8, %c0_9] : memref<2x6x384xf32, #tpu.memory_space<vmem>>, vector<1x6x384xf32>
    %19 = vector.shape_cast %18 : vector<1x6x384xf32> to vector<6x384xf32>
    %20 = vector.shape_cast %17 : vector<6x384xf32> to vector<1x6x384xf32>
    tpu.vector_store %arg2[%c0_7, %c0_8, %c0_9], %20 {strides = array<i32>} : memref<2x6x384xf32, #tpu.memory_space<vmem>>, vector<1x6x384xf32>,
    %21 = math.cos %16 : vector<6x384xf32>
    %c1 = arith.constant 1 : index
    %c0_10 = arith.constant 0 : index
    %c0_11 = arith.constant 0 : index
    %22 = vector.load %arg2[%c1, %c0_10, %c0_11] : memref<2x6x384xf32, #tpu.memory_space<vmem>>, vector<1x6x384xf32>
    %23 = vector.shape_cast %22 : vector<1x6x384xf32> to vector<6x384xf32>
    %24 = vector.shape_cast %21 : vector<6x384xf32> to vector<1x6x384xf32>
    tpu.vector_store %arg2[%c1, %c0_10, %c0_11], %24 {strides = array<i32>} : memref<2x6x384xf32, #tpu.memory_space<vmem>>, vector<1x6x384xf32>,
    return
  }
  func.func @transform_0(%arg0: i32) -> (i32, i32) {
    %c0_i32 = arith.constant 0 : i32
    %c0_i32_0 = arith.constant 0 : i32
    return %c0_i32, %arg0 : i32, i32
  }
  func.func @transform_1(%arg0: i32) -> (i32, i32, i32) {
    %c0_i32 = arith.constant 0 : i32
    %c0_i32_0 = arith.constant 0 : i32
    %c0_i32_1 = arith.constant 0 : i32
    return %c0_i32, %c0_i32_0, %arg0 : i32, i32, i32
  }
}

</mosaic_0001>

<bundles_post_ra>
// kernel: tpu_custom_call.1
= control target key start
LH: loop header
LB: loop body
LE: loop exit
PB: predicated region body
PF: predicated region fallthrough
CT: control target
= control target key end

     0   :  { %6 = vsyncpa [#allocation3], 0  ;;  %s1100_s9 = smov [#allocation2]   ;;  %s1495_s0 = inlined_call_operand.hbm [shape: f32[1,384], index: 0, kind: input, shape index: {}]   ;;  %s1496_s1 = inlined_call_operand.vmem [shape: f32[2,6,384], index: 1, kind: output, shape index: {}]  }
   0x1   :  { %s12_s8 = sshll.u32 %s1495_s0, 4  ;;  %s14_s10 = sshll.u32 %s1100_s9, 4  ;;  %s13_s8 = int_to_ptr.hbm [resolvable:$true] %s12_s8  ;;  %s15_s10 = int_to_ptr.vmem [resolvable:$true] %s14_s10 }
   0x2   :  { %17 = dma.hbm_to_vmem [thread:$0]  %s13_s8, 48, %s15_s10, [#allocation3]  }
   0x3   :  { %1098 = dma.done.wait [#allocation3], 48  }
   0x4   :  { %1099 = vsyncadd [#allocation3], 4294967248  ;;  %v22_v0 = vld [vmem:[#allocation2] sm:$0x7]  ;;  %vm84_vm2 = vcmask 1040384   ;;  %vm88_vm3 = vcmask 1041408  }
   0x5   :  { %v23_v1 = vadd.f32 1e-08, %v22_v0  ;;  %vm92_vm4 = vcmask 1042432   ;;  %vm96_vm5 = vcmask 1043456   ;;  %vm100_vm6 = vcmask 1044480  }
   0x7   :  { %1072 = vrsqrt.f32 %v23_v1  ;;  %vm31_vm0 = vcmp.eq.f32.partialorder %v23_v1, inf  ;;  %v34_v8 = vand.u32 2147483648, %v23_v1  ;;  %vm33_vm1 = vcmp.eq.f32.partialorder %v23_v1, 0.0 }
   0xd   :  { %v1073_v2 = vpop.eup %1072 }
   0xe   :  { %v25_v3 = vmul.f32 %v1073_v2, %v23_v1 }
  0x10   :  { %v26_v4 = vmul.f32 %v1073_v2, %v25_v3 }
  0x12   :  { %v27_v5 = vmul.f32 0.5, %v26_v4 }
  0x14   :  { %v28_v6 = vsub.f32 1.5, %v27_v5 }
  0x16   :  { %v29_v7 = vmul.f32 %v1073_v2, %v28_v6 }
  0x18   :  { %v30_v9 = vmul.f32 %v29_v7, %v23_v1 }
  0x1a   :  { %v32_v10 = vsel %vm31_vm0, %v23_v1, %v30_v9 }
  0x1b   :  { %v35_v11 = vsel %vm33_vm1, %v34_v8, %v32_v10 }
  0x1c   :  { %v36_v12 = vmul.f32 0.41887903, %v35_v11  ;;  %v37_v13 = vmul.f32 1.6755161, %v35_v11  ;;  %v38_v14 = vmul.f32 6.7020645, %v35_v11 }
  0x1d   :  { %v39_v15 = vmul.f32 26.808258, %v35_v11  ;;  %v40_v16 = vmul.f32 107.23303, %v35_v11  ;;  %v41_v17 = vmul.f32 428.93213, %v35_v11 }
  0x1e   :  { %v43_v18 = vperm.slane %v36_v12, 0  ;;  %v44_v19 = vperm.slane %v36_v12, 1  ;;  %v45_v20 = vperm.slane %v36_v12, 2  ;;  %v50_v21 = vperm.slane %v37_v13, 0 }
  0x1f   :  { %v51_v22 = vperm.slane %v37_v13, 1  ;;  %v52_v23 = vperm.slane %v37_v13, 2  ;;  %v57_v24 = vperm.slane %v38_v14, 0  ;;  %v58_v25 = vperm.slane %v38_v14, 1 }
  0x20   :  { %v59_v26 = vperm.slane %v38_v14, 2  ;;  %v64_v27 = vperm.slane %v39_v15, 0  ;;  %v65_v28 = vperm.slane %v39_v15, 1  ;;  %v66_v29 = vperm.slane %v39_v15, 2 }
  0x21   :  { %v71_v30 = vperm.slane %v40_v16, 0  ;;  %v72_v31 = vperm.slane %v40_v16, 1  ;;  %v73_v32 = vperm.slane %v40_v16, 2  ;;  %v78_v33 = vperm.slane %v41_v17, 0 }
  0x22   :  { %v79_v34 = vperm.slane %v41_v17, 1  ;;  %v85_v35 = vsel %vm84_vm2, %v43_v18, %v50_v21  ;;  %v86_v36 = vsel %vm84_vm2, %v44_v19, %v51_v22  ;;  %v80_v37 = vperm.slane %v41_v17, 2 }
  0x23   :  { %v87_v38 = vsel %vm84_vm2, %v45_v20, %v52_v23  ;;  %v89_v39 = vsel %vm88_vm3, %v85_v35, %v57_v24  ;;  %v90_v40 = vsel %vm88_vm3, %v86_v36, %v58_v25  ;;  %v1101_v12 = vmov 683565275  }
  0x24   :  { %v91_v41 = vsel %vm88_vm3, %v87_v38, %v59_v26  ;;  %v93_v42 = vsel %vm92_vm4, %v89_v39, %v64_v27  ;;  %v94_v43 = vsel %vm92_vm4, %v90_v40, %v65_v28  ;;  %v1102_v14 = vmov 2475754826  }
  0x25   :  { %v95_v44 = vsel %vm92_vm4, %v91_v41, %v66_v29  ;;  %v97_v45 = vsel %vm96_vm5, %v93_v42, %v71_v30  ;;  %v98_v46 = vsel %vm96_vm5, %v94_v43, %v72_v31  ;;  %v1103_v16 = vmov 2131351028  }
  0x26   :  { %v99_v47 = vsel %vm96_vm5, %v95_v44, %v73_v32  ;;  %v1134_v48 = vsel %vm100_vm6, %v97_v45, %v78_v33  ;;  %v1137_v49 = vsel %vm100_vm6, %v98_v46, %v79_v34  ;;  %v1104_v18 = vmov 2102212464  }
  0x27   :  { %v1140_v50 = vsel %vm100_vm6, %v99_v47, %v80_v37  ;;  %v104_v51 = vand.u32 2147483647, %v1134_v48  ;;  %v107_v52 = vand.u32 2139095040, %v1134_v48  ;;  %v259_v53 = vand.u32 2147483647, %v1137_v49 }
  0x28   :  { %v262_v54 = vand.u32 2139095040, %v1137_v49  ;;  %v417_v55 = vand.u32 2139095040, %v1140_v50  ;;  %v1105_v20 = vmov 920167782   ;;  %v1106_v29 = vmov 1326507024  }
  0x29   :  { %v108_v56 = vshrl.u32 %v107_v52, 23  ;;  %v111_v57 = vand.u32 8388607, %v104_v51  ;;  %v266_v59 = vand.u32 8388607, %v259_v53 }
  0x2a   :  { %v263_v58 = vshrl.u32 %v262_v54, 23  ;;  %v418_v63 = vshrl.u32 %v417_v55, 23 }
  0x2b   :  { %v1043_v60 = vadd.s32 4294967169, %v108_v56  ;;  %v112_v61 = vor.u32 8388608, %v111_v57  ;;  %v267_v1 = vor.u32 8388608, %v266_v59 }
  0x2c   :  { %v1046_v62 = vadd.s32 4294967169, %v263_v58  ;;  %v1049_v5 = vadd.s32 4294967169, %v418_v63 }
  0x2d   :  { %v114_v0 = vadd.s32 1, %v1043_v60  ;;  %v1151_v4 = vshll.u32 %v112_v61, 8  ;;  %v1157_v10 = vshll.u32 %v267_v1, 8 }
  0x2e   :  { %v269_v2 = vadd.s32 1, %v1046_v62  ;;  %v1165_v23 = vadd.s32 1, %v1049_v5 }
  0x2f   :  { %vm115_vm7 = vcmp.gt.s32.totalorder %v114_v0, 0  ;;  %v153_v22 = vand.u32 65535, %v1151_v4  ;;  %v154_v27 = vshrl.u32 %v1151_v4, 16 }
  0x30   :  { %v116_v3 = vsel %vm115_vm7, %v114_v0, 0  ;;  %vm270_vm8 = vcmp.gt.s32.totalorder %v269_v2, 0  ;;  %vm425_vm6 = vcmp.gt.s32.totalorder %v1165_v23, 0 }
  0x31   :  { %v118_v6 = vand.u32 31, %v116_v3  ;;  %v271_v7 = vsel %vm270_vm8, %v269_v2, 0  ;;  %v1153_v8 = vshrl.u32 %v116_v3, 5 }
  0x32   :  { %v1155_v9 = vand.u32 31, %v271_v7  ;;  %v1185_v40 = vshrl.u32 %v271_v7, 5 }
  0x33   :  { %v119_v11 = vsub.s32 32, %v118_v6  ;;  %v121_v13 = vshll.u32 %v1101_v12, %v118_v6  ;;  %v124_v15 = vshll.u32 %v1102_v14, %v118_v6  ;;  %v127_v17 = vshll.u32 %v1103_v16, %v118_v6 }
  0x34   :  { %v130_v19 = vshll.u32 %v1104_v18, %v118_v6  ;;  %v133_v21 = vshll.u32 %v1105_v20, %v118_v6  ;;  %vm136_vm9 = vcmp.lt.s32.totalorder %v1153_v8, 1  ;;  %vm139_vm10 = vcmp.lt.s32.totalorder %v1153_v8, 4 }
  0x35   :  { %v122_v24 = vshrl.u32 %v1102_v14, %v119_v11  ;;  %v125_v25 = vshrl.u32 %v1103_v16, %v119_v11  ;;  %v128_v26 = vshrl.u32 %v1104_v18, %v119_v11  ;;  %v131_v28 = vshrl.u32 %v1105_v20, %v119_v11 }
  0x36   :  { %v134_v30 = vshrl.u32 %v1106_v29, %v119_v11  ;;  %v1176_v34 = vsub.s32 32, %v1155_v9  ;;  %v120_v35 = vshrl.u32 %v1101_v12, %v119_v11  ;;  %vm138_vm11 = vcmp.lt.s32.totalorder %v1153_v8, 3 }
  0x37   :  { %v123_v31 = vor.u32 %v122_v24, %v121_v13  ;;  %v126_v32 = vor.u32 %v125_v25, %v124_v15  ;;  %v129_v33 = vor.u32 %v128_v26, %v127_v17  ;;  %v132_v36 = vor.u32 %v131_v28, %v130_v19 }
  0x38   :  { %v135_v37 = vor.u32 %v134_v30, %v133_v21  ;;  %vm137_vm12 = vcmp.lt.s32.totalorder %v1153_v8, 2  ;;  %v276_v43 = vshll.u32 %v1101_v12, %v1155_v9  ;;  %v279_v44 = vshll.u32 %v1102_v14, %v1155_v9 }
  0x39   :  { %v144_v38 = vsel %vm136_vm9, %v123_v31, %v126_v32  ;;  %v148_v39 = vsel %vm136_vm9, %v126_v32, %v129_v33  ;;  %v145_v41 = vsel %vm139_vm10, %v132_v36, 920167782  ;;  %v141_v45 = vsel %vm139_vm10, %v129_v33, 2102212464 }
  0x3a   :  { %v149_v42 = vsel %vm139_vm10, %v135_v37, 1326507024  ;;  %v146_v46 = vsel %vm138_vm11, %v129_v33, %v145_v41  ;;  %v277_v52 = vshrl.u32 %v1102_v14, %v1176_v34  ;;  %v140_v54 = vsel %vm136_vm9, %v120_v35, %v123_v31 }
  0x3b   :  { %v150_v47 = vsel %vm138_vm11, %v132_v36, %v149_v42  ;;  %v147_v55 = vsel %vm137_vm12, %v144_v38, %v146_v46  ;;  %v280_v57 = vshrl.u32 %v1103_v16, %v1176_v34  ;;  %v142_v62 = vsel %vm138_vm11, %v126_v32, %v141_v45 }
  0x3c   :  { %v151_v56 = vsel %vm137_vm12, %v148_v39, %v150_v47  ;;  %v177_v60 = vand.u32 65535, %v147_v55  ;;  %v178_v61 = vshrl.u32 %v147_v55, 16  ;;  %v1213_v63 = vor.u32 %v277_v52, %v276_v43 }
  0x3d   :  { %v155_v58 = vand.u32 65535, %v151_v56  ;;  %v156_v59 = vshrl.u32 %v151_v56, 16  ;;  %v1215_v0 = vor.u32 %v280_v57, %v279_v44  ;;  %v282_v1 = vshll.u32 %v1103_v16, %v1155_v9 }
  0x3e   :  { %v283_v6 = vshrl.u32 %v1104_v18, %v1176_v34  ;;  %v179_v11 = vmul.u32 %v177_v60, %v153_v22  ;;  %v180_v13 = vmul.u32 %v178_v61, %v153_v22  ;;  %v181_v15 = vmul.u32 %v177_v60, %v154_v27 }
  0x3f   :  { %v157_v2 = vmul.u32 %v155_v58, %v153_v22  ;;  %v158_v3 = vmul.u32 %v156_v59, %v153_v22  ;;  %v159_v5 = vmul.u32 %v155_v58, %v154_v27  ;;  %v160_v7 = vmul.u32 %v156_v59, %v154_v27 }
  0x40   :  { %v182_v24 = vmul.u32 %v178_v61, %v154_v27  ;;  %v183_v26 = vshll.u32 %v180_v13, 16  ;;  %v184_v28 = vshrl.u32 %v180_v13, 16  ;;  %v185_v30 = vshll.u32 %v181_v15, 16 }
  0x41   :  { %v161_v17 = vshll.u32 %v158_v3, 16  ;;  %v162_v19 = vshrl.u32 %v158_v3, 16  ;;  %v163_v21 = vshll.u32 %v159_v5, 16  ;;  %v164_v25 = vshrl.u32 %v159_v5, 16 }
  0x42   :  { %v186_v32 = vshrl.u32 %v181_v15, 16  ;;  %v285_v33 = vshll.u32 %v1104_v18, %v1155_v9  ;;  %v1107_v35 = vmov 0   ;;  %vm187_vm14 = vc.u32 %v179_v11, %v183_v26 }
  0x43   :  { %vm165_vm13 = vc.u32 %v157_v2, %v161_v17  ;;  %v167_v31 = vadd.s32 %v161_v17, %v157_v2  ;;  %v189_v22 = vadd.s32 %v183_v26, %v179_v11  ;;  %v286_v37 = vshrl.u32 %v1105_v20, %v1176_v34 }
  0x44   :  { %v166_v36 = vsel %vm165_vm13, 1, %v1107_v35  ;;  %v188_v27 = vsel %vm187_vm14, 1, %v1107_v35  ;;  %v288_v39 = vshll.u32 %v1105_v20, %v1155_v9  ;;  %v284_v43 = vor.u32 %v283_v6, %v282_v1 }
  0x45   :  { %v168_v38 = vadd.s32 %v166_v36, %v160_v7  ;;  %vm169_vm15 = vc.u32 %v167_v31, %v163_v21  ;;  %v190_v42 = vadd.s32 %v188_v27, %v182_v24  ;;  %vm191_vm0 = vc.u32 %v189_v22, %v185_v30 }
  0x46   :  { %v170_v41 = vsel %vm169_vm15, 1, %v1107_v35  ;;  %v192_v45 = vsel %vm191_vm0, 1, %v1107_v35  ;;  %v287_v46 = vor.u32 %v286_v37, %v285_v33  ;;  %v289_v47 = vshrl.u32 %v1106_v29, %v1176_v34 }
  0x47   :  { %v172_v44 = vadd.s32 %v170_v41, %v168_v38  ;;  %v1233_v52 = vadd.s32 %v189_v22, %v185_v30  ;;  %v194_v55 = vadd.s32 %v192_v45, %v190_v42  ;;  %vm291_vm1 = vcmp.lt.s32.totalorder %v1185_v40, 1 }
  0x48   :  { %vm293_vm2 = vcmp.lt.s32.totalorder %v1185_v40, 3  ;;  %v290_v56 = vor.u32 %v289_v47, %v288_v39  ;;  %vm292_vm3 = vcmp.lt.s32.totalorder %v1185_v40, 2  ;;  %vm294_vm4 = vcmp.lt.s32.totalorder %v1185_v40, 4 }
  0x49   :  { %v173_v9 = vadd.s32 %v172_v44, %v162_v19  ;;  %v143_v57 = vsel %vm137_vm12, %v140_v54, %v142_v62  ;;  %v195_v58 = vadd.s32 %v194_v55, %v184_v28  ;;  %v299_v59 = vsel %vm291_vm1, %v1213_v63, %v1215_v0 }
  0x4a   :  { %v300_v60 = vsel %vm294_vm4, %v287_v46, 920167782  ;;  %v303_v2 = vsel %vm291_vm1, %v1215_v0, %v284_v43  ;;  %v308_v8 = vand.u32 65535, %v1157_v10  ;;  %v304_v3 = vsel %vm294_vm4, %v290_v56, 1326507024 }
  0x4b   :  { %v1247_v61 = vadd.s32 %v173_v9, %v164_v25  ;;  %v301_v1 = vsel %vm293_vm2, %v284_v43, %v300_v60  ;;  %v196_v54 = vadd.s32 %v195_v58, %v186_v32  ;;  %v309_v5 = vshrl.u32 %v1157_v10, 16 }
  0x4c   :  { %v302_v62 = vsel %vm292_vm3, %v299_v59, %v301_v1  ;;  %v197_v6 = vmul.u32 %v1151_v4, %v143_v57  ;;  %v305_v7 = vsel %vm293_vm2, %v287_v46, %v304_v3  ;;  %v275_v19 = vshrl.u32 %v1101_v12, %v1176_v34 }
  0x4d   :  { %vm199_vm5 = vc.u32 %v1247_v61, %v1233_v52  ;;  %v332_v11 = vand.u32 65535, %v302_v62  ;;  %v200_v13 = vadd.s32 1, %v196_v54  ;;  %v306_v15 = vsel %vm292_vm3, %v303_v2, %v305_v7 }
  0x4e   :  { %v333_v17 = vshrl.u32 %v302_v62, 16  ;;  %v310_v21 = vand.u32 65535, %v306_v15  ;;  %v311_v24 = vshrl.u32 %v306_v15, 16  ;;  %v296_v25 = vsel %vm294_vm4, %v284_v43, 2102212464 }
  0x4f   :  { %v201_v4 = vsel %vm199_vm5, %v200_v13, %v196_v54  ;;  %v336_v28 = vmul.u32 %v332_v11, %v309_v5  ;;  %v334_v33 = vmul.u32 %v332_v11, %v308_v8  ;;  %v426_v37 = vsel %vm425_vm6, %v1165_v23, 0 }
  0x50   :  { %v335_v26 = vmul.u32 %v333_v17, %v308_v8  ;;  %v202_v30 = vadd.s32 %v201_v4, %v197_v6  ;;  %v312_v31 = vmul.u32 %v310_v21, %v308_v8  ;;  %v313_v32 = vmul.u32 %v311_v24, %v308_v8 }
  0x51   :  { %v314_v36 = vmul.u32 %v310_v21, %v309_v5  ;;  %v295_v34 = vsel %vm291_vm1, %v275_v19, %v1213_v63  ;;  %v315_v27 = vmul.u32 %v311_v24, %v309_v5  ;;  %v297_v41 = vsel %vm293_vm2, %v1215_v0, %v296_v25 }
  0x52   :  { %v338_v22 = vshll.u32 %v335_v26, 16  ;;  %v203_v38 = vadd.s32 536870912, %v202_v30  ;;  %v316_v39 = vshll.u32 %v313_v32, 16  ;;  %v337_v43 = vmul.u32 %v333_v17, %v309_v5 }
  0x53   :  { %v318_v42 = vshll.u32 %v314_v36, 16  ;;  %v340_v44 = vshll.u32 %v336_v28, 16  ;;  %v317_v23 = vshrl.u32 %v313_v32, 16  ;;  %v339_v57 = vshrl.u32 %v335_v26, 16 }
  0x54   :  { %v1279_v45 = vshrl.u32 %v203_v38, 30  ;;  %vm320_vm7 = vc.u32 %v312_v31, %v316_v39  ;;  %v322_v46 = vadd.s32 %v316_v39, %v312_v31  ;;  %vm342_vm8 = vc.u32 %v334_v33, %v338_v22 }
  0x55   :  { %v321_v47 = vsel %vm320_vm7, 1, %v1107_v35  ;;  %v343_v55 = vsel %vm342_vm8, 1, %v1107_v35  ;;  %v344_v63 = vadd.s32 %v338_v22, %v334_v33  ;;  %v428_v59 = vand.u32 31, %v426_v37 }
  0x56   :  { %v205_v9 = vshll.u32 %v1279_v45, 30  ;;  %v323_v56 = vadd.s32 %v321_v47, %v315_v27  ;;  %vm324_vm9 = vc.u32 %v322_v46, %v318_v42  ;;  %v345_v58 = vadd.s32 %v343_v55, %v337_v43 }
  0x57   :  { %v325_v0 = vsel %vm324_vm9, 1, %v1107_v35  ;;  %vm346_vm10 = vc.u32 %v344_v63, %v340_v44  ;;  %v319_v1 = vshrl.u32 %v314_v36, 16  ;;  %v341_v54 = vshrl.u32 %v336_v28, 16 }
  0x58   :  { %v206_v60 = vsub.s32 %v202_v30, %v205_v9  ;;  %v327_v2 = vadd.s32 %v325_v0, %v323_v56  ;;  %v347_v8 = vsel %vm346_vm10, 1, %v1107_v35  ;;  %v414_v3 = vand.u32 2147483647, %v1140_v50 }
  0x59   :  { %v349_v62 = vadd.s32 %v347_v8, %v345_v58  ;;  %v1287_v7 = vadd.s32 %v344_v63, %v340_v44  ;;  %v298_v11 = vsel %vm292_vm3, %v295_v34, %v297_v41  ;;  %v1291_v15 = vsub.s32 32, %v428_v59 }
  0x5a   :  { %vm207_vm11 = vcmp.lt.s32.totalorder %v206_v60, 0  ;;  %v208_v5 = vsub.s32 0, %v206_v60  ;;  %v328_v6 = vadd.s32 %v327_v2, %v317_v23  ;;  %v421_v4 = vand.u32 8388607, %v414_v3 }
  0x5b   :  { %v350_v13 = vadd.s32 %v349_v62, %v339_v57  ;;  %v198_v25 = vadd.s32 %v1233_v52, %v1247_v61  ;;  %v352_v26 = vmul.u32 %v1157_v10, %v298_v11  ;;  %v1302_v40 = vshrl.u32 %v426_v37, 5 }
  0x5c   :  { %v209_v17 = vsel %vm207_vm11, %v208_v5, %v206_v60  ;;  %v1293_v19 = vadd.s32 %v328_v6, %v319_v1  ;;  %vm106_vm13 = vcmp.lt.s32.totalorder %v1134_v48, 0  ;;  %v440_v31 = vshll.u32 %v1104_v18, %v428_v59 }
  0x5d   :  { %v210_v21 = vclz %v209_v17  ;;  %v351_v24 = vadd.s32 %v350_v13, %v341_v54  ;;  %v441_v32 = vshrl.u32 %v1105_v20, %v1291_v15  ;;  %v431_v33 = vshll.u32 %v1101_v12, %v428_v59 }
  0x5e   :  { %vm354_vm12 = vc.u32 %v1293_v19, %v1287_v7  ;;  %v432_v52 = vshrl.u32 %v1102_v14, %v1291_v15  ;;  %v434_v10 = vshll.u32 %v1102_v14, %v428_v59  ;;  %v435_v61 = vshrl.u32 %v1103_v16, %v1291_v15 }
  0x5f   :  { %v1044_v28 = vadd.s32 4294967294, %v210_v21  ;;  %v355_v30 = vadd.s32 1, %v351_v24  ;;  %v437_v22 = vshll.u32 %v1103_v16, %v428_v59  ;;  %v438_v37 = vshrl.u32 %v1104_v18, %v1291_v15 }
  0x60   :  { %v443_v27 = vshll.u32 %v1105_v20, %v428_v59  ;;  %v444_v39 = vshrl.u32 %v1106_v29, %v1291_v15  ;;  %v442_v43 = vor.u32 %v441_v32, %v440_v31  ;;  %v228_v44 = vsub.s32 4, %v1279_v45 }
  0x61   :  { %vm1045_vm14 = vcmp.lt.s32.totalorder %v1044_v28, 0  ;;  %v356_v36 = vsel %vm354_vm12, %v355_v30, %v351_v24  ;;  %v1321_v23 = vor.u32 %v432_v52, %v431_v33  ;;  %v1323_v16 = vor.u32 %v435_v61, %v434_v10 }
  0x62   :  { %v213_v38 = vsel %vm1045_vm14, 0, %v1044_v28  ;;  %v357_v34 = vadd.s32 %v356_v36, %v352_v26  ;;  %v1325_v55 = vor.u32 %v438_v37, %v437_v22  ;;  %vm446_vm15 = vcmp.lt.s32.totalorder %v1302_v40, 1 }
  0x63   :  { %v214_v41 = vsub.s32 32, %v213_v38  ;;  %v215_v42 = vshll.u32 %v206_v60, %v213_v38  ;;  %v218_v14 = vsub.s32 4294967266, %v213_v38  ;;  %v445_v29 = vor.u32 %v444_v39, %v443_v27 }
  0x64   :  { %v358_v46 = vadd.s32 536870912, %v357_v34  ;;  %vm448_vm0 = vcmp.lt.s32.totalorder %v1302_v40, 3  ;;  %vm449_vm1 = vcmp.lt.s32.totalorder %v1302_v40, 4  ;;  %v422_v56 = vor.u32 8388608, %v421_v4 }
  0x65   :  { %v216_v47 = vshrl.u32 %v198_v25, %v214_v41  ;;  %v219_v18 = vadd.s32 127, %v218_v14  ;;  %v455_v57 = vsel %vm449_vm1, %v442_v43, 920167782  ;;  %v229_v0 = vsel %vm106_vm13, %v228_v44, %v1279_v45 }
  0x66   :  { %v1328_v20 = vshrl.u32 %v358_v46, 30  ;;  %vm447_vm2 = vcmp.lt.s32.totalorder %v1302_v40, 2  ;;  %v454_v1 = vsel %vm446_vm15, %v1321_v23, %v1323_v16  ;;  %v456_v2 = vsel %vm448_vm0, %v1325_v55, %v455_v57 }
  0x67   :  { %v217_v63 = vor.u32 %v216_v47, %v215_v42  ;;  %v220_v9 = vshll.u32 %v219_v18, 23  ;;  %vm1348_vm3 = vcmp.le.f32.partialorder %v104_v51, 0.7853982  ;;  %v458_v54 = vsel %vm446_vm15, %v1323_v16, %v1325_v55 }
  0x68   :  { %v360_v58 = vshll.u32 %v1328_v20, 30  ;;  %v459_v62 = vsel %vm449_vm1, %v445_v29, 1326507024  ;;  %v1360_v6 = vsel %vm1348_vm3, 0, %v229_v0  ;;  %v1364_v11 = vshll.u32 %v422_v56, 8 }
  0x69   :  { %v221_v59 = vor.u32 4788187, %v220_v9  ;;  %v224_v60 = vcvt.s32.f32 %v217_v63  ;;  %v460_v51 = vsel %vm448_vm0, %v442_v43, %v459_v62  ;;  %v457_v17 = vsel %vm447_vm2, %v454_v1, %v456_v2 }
  0x6a   :  { %v361_v45 = vsub.s32 %v357_v34, %v360_v58  ;;  %v461_v21 = vsel %vm447_vm2, %v458_v54, %v460_v51  ;;  %v463_v4 = vand.u32 65535, %v1364_v11  ;;  %v464_v25 = vshrl.u32 %v1364_v11, 16 }
  0x6b   :  { %v222_v5 = vand.u32 2147483647, %v221_v59  ;;  %v465_v26 = vand.u32 65535, %v461_v21  ;;  %v466_v30 = vshrl.u32 %v461_v21, 16  ;;  %v248_v32 = vadd.s32 3, %v1360_v6 }
  0x6c   :  { %vm362_vm4 = vcmp.lt.s32.totalorder %v361_v45, 0  ;;  %v363_v13 = vsub.s32 0, %v361_v45  ;;  %v488_v36 = vshrl.u32 %v457_v17, 16  ;;  %v353_v37 = vadd.s32 %v1287_v7, %v1293_v19 }
  0x6d   :  { %v225_v24 = vmul.f32 %v224_v60, %v222_v5  ;;  %v1373_v52 = vmul.u32 %v465_v26, %v464_v25  ;;  %v467_v10 = vmul.u32 %v465_v26, %v463_v4  ;;  %v468_v61 = vmul.u32 %v466_v30, %v463_v4 }
  0x6e   :  { %v364_v28 = vsel %vm362_vm4, %v363_v13, %v361_v45  ;;  %v430_v34 = vshrl.u32 %v1101_v12, %v1291_v15  ;;  %v487_v42 = vand.u32 65535, %v457_v17  ;;  %v1389_v43 = vand.u32 3, %v248_v32 }
  0x6f   :  { %v226_v31 = vxor.u32 2147483648, %v225_v24  ;;  %v365_v33 = vclz %v364_v28  ;;  %v471_v39 = vshll.u32 %v468_v61, 16  ;;  %v473_v41 = vshll.u32 %v1373_v52, 16 }
  0x70   :  { %v470_v7 = vmul.u32 %v466_v30, %v464_v25  ;;  %v1391_v12 = vmul.u32 %v488_v36, %v463_v4  ;;  %v491_v9 = vmul.u32 %v487_v42, %v464_v25  ;;  %vm254_vm8 = vcmp.eq.s32.totalorder %v1389_v43, 2 }
  0x71   :  { %v227_v22 = vsel %vm106_vm13, %v226_v31, %v225_v24  ;;  %v1047_v38 = vadd.s32 4294967294, %v365_v33  ;;  %vm475_vm6 = vc.u32 %v467_v10, %v471_v39  ;;  %v477_v44 = vadd.s32 %v471_v39, %v467_v10 }
  0x72   :  { %v1384_v27 = vsel %vm1348_vm3, %v1134_v48, %v227_v22  ;;  %v476_v63 = vsel %vm475_vm6, 1, %v1107_v35  ;;  %v472_v60 = vshrl.u32 %v468_v61, 16  ;;  %v489_v1 = vmul.u32 %v487_v42, %v463_v4 }
  0x73   :  { %v232_v14 = vmul.f32 %v1384_v27, %v1384_v27  ;;  %vm1048_vm5 = vcmp.lt.s32.totalorder %v1047_v38, 0  ;;  %vm479_vm7 = vc.u32 %v477_v44, %v473_v41  ;;  %v478_v58 = vadd.s32 %v476_v63, %v470_v7 }
  0x74   :  { %v368_v19 = vsel %vm1048_vm5, 0, %v1047_v38  ;;  %vm261_vm9 = vcmp.lt.s32.totalorder %v1137_v49, 0  ;;  %vm1399_vm10 = vcmp.le.f32.partialorder %v259_v53, 0.7853982  ;;  %v492_v13 = vmul.u32 %v488_v36, %v464_v25 }
  0x75   :  { %v233_v15 = vmul.f32 -0.001358992, %v232_v14  ;;  %v240_v46 = vmul.f32 -0.00019511016, %v232_v14  ;;  %v369_v47 = vsub.s32 32, %v368_v19  ;;  %v370_v18 = vshll.u32 %v361_v45, %v368_v19 }
  0x76   :  { %v373_v29 = vsub.s32 4294967266, %v368_v19  ;;  %v480_v45 = vsel %vm479_vm7, 1, %v1107_v35  ;;  %v493_v17 = vshll.u32 %v1391_v12, 16  ;;  %vm250_vm11 = vcmp.lt.s32.totalorder %v1389_v43, 2 }
  0x77   :  { %v234_v56 = vadd.f32 0.041655596, %v233_v15  ;;  %v241_v57 = vadd.f32 0.008332121, %v240_v46  ;;  %v371_v0 = vshrl.u32 %v353_v37, %v369_v47  ;;  %v482_v51 = vadd.s32 %v480_v45, %v478_v58 }
  0x78   :  { %v374_v59 = vadd.s32 127, %v373_v29  ;;  %v450_v4 = vsel %vm446_vm15, %v430_v34, %v1321_v23  ;;  %v495_v26 = vshll.u32 %v491_v9, 16  ;;  %v451_v53 = vsel %vm449_vm1, %v1325_v55, 2102212464 }
  0x79   :  { %v235_v2 = vmul.f32 %v234_v56, %v232_v14  ;;  %v242_v8 = vmul.f32 %v241_v57, %v232_v14  ;;  %v372_v54 = vor.u32 %v371_v0, %v370_v18  ;;  %vm497_vm12 = vc.u32 %v489_v1, %v493_v17 }
  0x7a   :  { %v375_v5 = vshll.u32 %v374_v59, 23  ;;  %v498_v32 = vsel %vm497_vm12, 1, %v1107_v35  ;;  %v499_v33 = vadd.s32 %v493_v17, %v489_v1  ;;  %v474_v61 = vshrl.u32 %v1373_v52, 16 }
  0x7b   :  { %v236_v21 = vadd.f32 -0.4999988, %v235_v2  ;;  %v243_v24 = vadd.f32 -0.16666654, %v242_v8  ;;  %v379_v30 = vcvt.s32.f32 %v372_v54  ;;  %v483_v36 = vadd.s32 %v482_v51, %v472_v60 }
  0x7c   :  { %v376_v28 = vor.u32 4788187, %v375_v5  ;;  %v500_v22 = vadd.s32 %v498_v32, %v492_v13  ;;  %v494_v38 = vshrl.u32 %v1391_v12, 16  ;;  %vm501_vm13 = vc.u32 %v499_v33, %v495_v26 }
  0x7d   :  { %v237_v31 = vmul.f32 %v236_v21, %v232_v14  ;;  %v244_v25 = vmul.f32 %v243_v24, %v232_v14  ;;  %v383_v55 = vsub.s32 4, %v1328_v20  ;;  %v452_v39 = vsel %vm448_vm0, %v1323_v16, %v451_v53 }
  0x7e   :  { %v377_v10 = vand.u32 2147483647, %v376_v28  ;;  %v502_v41 = vsel %vm501_vm13, 1, %v1107_v35  ;;  %v496_v14 = vshrl.u32 %v491_v9, 16  ;;  %vm251_vm14 = vcmp.eq.s32.totalorder %v1389_v43, 0 }
  0x7f   :  { %v1413_v37 = vadd.f32 1.0, %v237_v31  ;;  %v245_v23 = vadd.f32 1.0, %v244_v25  ;;  %v504_v7 = vadd.s32 %v502_v41, %v500_v22  ;;  %v484_v44 = vadd.s32 %v483_v36, %v474_v61 }
  0x80   :  { %v380_v34 = vmul.f32 %v379_v30, %v377_v10  ;;  %v503_v12 = vadd.s32 %v499_v33, %v495_v26  ;;  %v453_v16 = vsel %vm447_vm2, %v450_v4, %v452_v39  ;;  %vm247_vm15 = vweird.f32 %v1134_v48 }
  0x81   :  { %v1422_v42 = vmul.f32 %v245_v23, %v1384_v27  ;;  %v255_v52 = vxor.u32 2147483648, %v1413_v37  ;;  %v505_v27 = vadd.s32 %v504_v7, %v494_v38  ;;  %v384_v18 = vsel %vm261_vm9, %v383_v55, %v1328_v20 }
  0x82   :  { %v381_v19 = vxor.u32 2147483648, %v380_v34  ;;  %v507_v56 = vmul.u32 %v1364_v11, %v453_v16  ;;  %vm509_vm0 = vc.u32 %v484_v44, %v503_v12  ;;  %v386_v58 = vsel %vm1399_vm10, 0, %v384_v18 }
  0x83   :  { %v252_v15 = vxor.u32 2147483648, %v1422_v42  ;;  %v256_v35 = vsel %vm254_vm8, %v255_v52, %v1422_v42  ;;  %v506_v40 = vadd.s32 %v505_v27, %v496_v14  ;;  %v403_v8 = vadd.s32 3, %v386_v58 }
  0x84   :  { %v382_v46 = vsel %vm261_vm9, %v381_v19, %v380_v34  ;;  %vm402_vm5 = vweird.f32 %v1137_v49  ;;  %v508_v38 = vadd.s32 %v503_v12, %v484_v44  ;;  %v716_v55 = vand.u32 3, %v1360_v6 }
  0x85   :  { %v253_v47 = vsel %vm251_vm14, %v1413_v37, %v252_v15  ;;  %v385_v29 = vsel %vm1399_vm10, %v1137_v49, %v382_v46  ;;  %v510_v0 = vadd.s32 1, %v506_v40  ;;  %v404_v62 = vand.u32 3, %v403_v8 }
  0x86   :  { %v257_v63 = vsel %vm250_vm11, %v253_v47, %v256_v35  ;;  %v387_v9 = vmul.f32 %v385_v29, %v385_v29  ;;  %v870_v39 = vand.u32 3, %v386_v58  ;;  %vm718_vm7 = vcmp.eq.s32.totalorder %v716_v55, 0 }
  0x87   :  { %v258_v57 = vsel %vm247_vm15, nan, %v257_v63  ;;  %v511_v60 = vsel %vm509_vm0, %v510_v0, %v506_v40  ;;  %vm409_vm1 = vcmp.eq.s32.totalorder %v404_v62, 2  ;;  %vm406_vm3 = vcmp.eq.s32.totalorder %v404_v62, 0 }
  0x88   :  { %v388_v20 = vmul.f32 -0.001358992, %v387_v9  ;;  %v395_v59 = vmul.f32 -0.00019511016, %v387_v9  ;;  %569 = vst [vmem:[%s1496_s1] sm:$0x3f] %v258_v57  ;;  %v512_v2 = vadd.s32 %v511_v60, %v507_v56  ;;  %vm405_vm4 = vcmp.lt.s32.totalorder %v404_v62, 2 }
  0x89   :  { %vm717_vm8 = vcmp.lt.s32.totalorder %v716_v55, 2  ;;  %v720_v44 = vsel %vm718_vm7, %v1413_v37, %v252_v15  ;;  %vm721_vm9 = vcmp.eq.s32.totalorder %v716_v55, 2  ;;  %vm871_vm10 = vcmp.lt.s32.totalorder %v870_v39, 2 }
  0x8a   :  { %v389_v43 = vadd.f32 0.041655596, %v388_v20  ;;  %v396_v1 = vadd.f32 0.008332121, %v395_v59  ;;  %v513_v45 = vadd.s32 536870912, %v512_v2  ;;  %vm872_vm11 = vcmp.eq.s32.totalorder %v870_v39, 0 }
  0x8b   :  { %vm875_vm12 = vcmp.eq.s32.totalorder %v870_v39, 2  ;;  %v723_v6 = vsel %vm721_vm9, %v255_v52, %v1422_v42  ;;  %vm416_vm13 = vcmp.lt.s32.totalorder %v1140_v50, 0  ;;  %vm415_vm14 = vcmp.le.f32.partialorder %v414_v3, 0.7853982 }
  0x8c   :  { %v390_v11 = vmul.f32 %v389_v43, %v387_v9  ;;  %v397_v54 = vmul.f32 %v396_v1, %v387_v9  ;;  %v1456_v13 = vshrl.u32 %v513_v45, 30  ;;  %v724_v46 = vsel %vm717_vm8, %v720_v44, %v723_v6 }
  0x8d   :  { %v725_v40 = vsel %vm247_vm15, nan, %v724_v46 }
  0x8e   :  { %v391_v5 = vadd.f32 -0.4999988, %v390_v11  ;;  %v398_v51 = vadd.f32 -0.16666654, %v397_v54  ;;  %v515_v24 = vshll.u32 %v1456_v13, 30  ;;  %v538_v42 = vsub.s32 4, %v1456_v13 }
  0x8f   :  { %1061 = vst [vmem:[%s1496_s1 + $0x18] sm:$0x3f] %v725_v40 }
  0x90   :  { %v392_v17 = vmul.f32 %v391_v5, %v387_v9  ;;  %v399_v21 = vmul.f32 %v398_v51, %v387_v9  ;;  %v516_v28 = vsub.s32 %v512_v2, %v515_v24  ;;  %v539_v52 = vsel %vm416_vm13, %v538_v42, %v1456_v13 }
  0x91   :  { %v541_v0 = vsel %vm415_vm14, 0, %v539_v52 }
  0x92   :  { %v393_v4 = vadd.f32 1.0, %v392_v17  ;;  %v400_v26 = vadd.f32 1.0, %v399_v21  ;;  %vm517_vm2 = vcmp.lt.s32.totalorder %v516_v28, 0  ;;  %v518_v31 = vsub.s32 0, %v516_v28 }
  0x93   :  { %v558_v43 = vadd.s32 3, %v541_v0  ;;  %v1024_v45 = vand.u32 3, %v541_v0 }
  0x94   :  { %v401_v30 = vmul.f32 %v400_v26, %v385_v29  ;;  %v410_v53 = vxor.u32 2147483648, %v393_v4  ;;  %v519_v33 = vsel %vm517_vm2, %v518_v31, %v516_v28 }
  0x95   :  { %v520_v10 = vclz %v519_v33  ;;  %v559_v54 = vand.u32 3, %v558_v43  ;;  %vm1029_vm0 = vcmp.eq.s32.totalorder %v1024_v45, 2 }
  0x96   :  { %v407_v25 = vxor.u32 2147483648, %v401_v30  ;;  %v411_v32 = vsel %vm409_vm1, %v410_v53, %v401_v30  ;;  %v877_v47 = vsel %vm875_vm12, %v410_v53, %v401_v30 }
  0x97   :  { %v1050_v22 = vadd.s32 4294967294, %v520_v10  ;;  %vm564_vm15 = vcmp.eq.s32.totalorder %v559_v54, 2  ;;  %vm560_vm1 = vcmp.lt.s32.totalorder %v559_v54, 2  ;;  %vm561_vm2 = vcmp.eq.s32.totalorder %v559_v54, 0 }
  0x98   :  { %v408_v61 = vsel %vm406_vm3, %v393_v4, %v407_v25  ;;  %v874_v27 = vsel %vm872_vm11, %v393_v4, %v407_v25  ;;  %vm1026_vm3 = vcmp.eq.s32.totalorder %v1024_v45, 0 }
  0x99   :  { %v412_v36 = vsel %vm405_vm4, %v408_v61, %v411_v32  ;;  %vm1051_vm6 = vcmp.lt.s32.totalorder %v1050_v22, 0  ;;  %v878_v63 = vsel %vm871_vm10, %v874_v27, %v877_v47  ;;  %vm1025_vm4 = vcmp.lt.s32.totalorder %v1024_v45, 2 }
  0x9a   :  { %v413_v23 = vsel %vm402_vm5, nan, %v412_v36  ;;  %v523_v34 = vsel %vm1051_vm6, 0, %v1050_v22  ;;  %v879_v15 = vsel %vm402_vm5, nan, %v878_v63  ;;  %vm557_vm5 = vweird.f32 %v1140_v50 }
  0x9b   :  { %570 = vst [vmem:[%s1496_s1 + $0x8] sm:$0x3f] %v413_v23  ;;  %v524_v41 = vsub.s32 32, %v523_v34  ;;  %v525_v14 = vshll.u32 %v516_v28, %v523_v34  ;;  %v528_v7 = vsub.s32 4294967266, %v523_v34 }
  0x9c   :  { %1062 = vst [vmem:[%s1496_s1 + $0x20] sm:$0x3f] %v879_v15 }
  0x9d   :  { %v526_v19 = vshrl.u32 %v508_v38, %v524_v41  ;;  %v529_v35 = vadd.s32 127, %v528_v7 }
  0x9f   :  { %v527_v12 = vor.u32 %v526_v19, %v525_v14  ;;  %v530_v16 = vshll.u32 %v529_v35, 23 }
  0xa1   :  { %v531_v18 = vor.u32 4788187, %v530_v16  ;;  %v534_v29 = vcvt.s32.f32 %v527_v12 }
  0xa3   :  { %v532_v9 = vand.u32 2147483647, %v531_v18 }
  0xa5   :  { %v535_v37 = vmul.f32 %v534_v29, %v532_v9 }
  0xa7   :  { %v536_v48 = vxor.u32 2147483648, %v535_v37 }
  0xa9   :  { %v537_v49 = vsel %vm416_vm13, %v536_v48, %v535_v37 }
  0xaa   :  { %v540_v56 = vsel %vm415_vm14, %v1140_v50, %v537_v49 }
  0xab   :  { %v542_v57 = vmul.f32 %v540_v56, %v540_v56 }
  0xad   :  { %v543_v58 = vmul.f32 -0.001358992, %v542_v57  ;;  %v550_v20 = vmul.f32 -0.00019511016, %v542_v57 }
  0xaf   :  { %v544_v59 = vadd.f32 0.041655596, %v543_v58  ;;  %v551_v60 = vadd.f32 0.008332121, %v550_v20 }
  0xb1   :  { %v545_v1 = vmul.f32 %v544_v59, %v542_v57  ;;  %v552_v2 = vmul.f32 %v551_v60, %v542_v57 }
  0xb3   :  { %v546_v8 = vadd.f32 -0.4999988, %v545_v1  ;;  %v553_v11 = vadd.f32 -0.16666654, %v552_v2 }
  0xb5   :  { %v547_v3 = vmul.f32 %v546_v8, %v542_v57  ;;  %v554_v5 = vmul.f32 %v553_v11, %v542_v57 }
  0xb7   :  { %v548_v51 = vadd.f32 1.0, %v547_v3  ;;  %v555_v62 = vadd.f32 1.0, %v554_v5 }
  0xb9   :  { %v556_v13 = vmul.f32 %v555_v62, %v540_v56  ;;  %v565_v17 = vxor.u32 2147483648, %v548_v51 }
  0xbb   :  { %v562_v21 = vxor.u32 2147483648, %v556_v13  ;;  %v566_v24 = vsel %vm564_vm15, %v565_v17, %v556_v13  ;;  %v1031_v4 = vsel %vm1029_vm0, %v565_v17, %v556_v13 }
  0xbd   :  { %v563_v26 = vsel %vm561_vm2, %v548_v51, %v562_v21  ;;  %v1028_v28 = vsel %vm1026_vm3, %v548_v51, %v562_v21 }
  0xbe   :  { %v567_v30 = vsel %vm560_vm1, %v563_v26, %v566_v24  ;;  %v1032_v53 = vsel %vm1025_vm4, %v1028_v28, %v1031_v4 }
  0xbf   :  { %v568_v31 = vsel %vm557_vm5, nan, %v567_v30  ;;  %v1033_v25 = vsel %vm557_vm5, nan, %v1032_v53 }
  0xc0   :  { %571 = vst [vmem:[%s1496_s1 + $0x10] sm:$0x3f] %v568_v31 }
  0xc1   :  { %1063 = vst [vmem:[%s1496_s1 + $0x28] sm:$0x3f] %v1033_v25 }
  0xc2   :  { %1042 = vsyncpa [#allocation3], 1 }

</bundles_post_ra>
